<compile_context>
chip_gen: v5e
topology: v5e:2x2
jax: 0.10.0
libtpu: 0.0.40
codegen_flags: <defaults>
</compile_context>

<pallas_src>
import functools
import math

import jax
import jax.numpy as jnp
from jax.experimental import pallas as pl
from jax.experimental.pallas import tpu as pltpu


class Config:
    vocab_size = 100
    hidden_size = 32
    num_layers = 2
    num_heads = 2
    intermediate_size = 64
    max_position = 32
    type_vocab_size = 2
    class_num = 2


CLS_PAD = 128  # lane-dense classifier output; real logits sliced outside


# ------------------------------ fused kernel ------------------------------

def _fused_cls_kernel(
    emb_ref, mask_ref,
    wqkv_ref, wo_ref, w1_ref, w2_ref, small_ref,
    poolw_ref, clsw_ref, pcb_ref,
    logits_ref,
    h_ref,                                   # VMEM scratch [B*S, H], persists across grid
    *, B, S, nH, dh, I,
):
    H = nH * dh
    layer = pl.program_id(0)
    f32, bf16 = jnp.float32, jnp.bfloat16

    def layernorm(x, g, b):
        # one-pass stats: E[x] and E[x^2] are independent reductions (XLU overlap)
        mean = jnp.mean(x, axis=-1, keepdims=True)
        mean_sq = jnp.mean(x * x, axis=-1, keepdims=True)
        var = mean_sq - mean * mean
        return (x - mean) * jax.lax.rsqrt(var + 1e-12) * g + b

    def dense(x, w, bias):
        # bf16 MXU operands, f32 accumulation.
        return jnp.dot(x.astype(bf16), w, preferred_element_type=f32) + bias

    # seed the VMEM-resident hidden state with the (already LayerNormed) embeddings
    @pl.when(layer == 0)
    def _():
        h_ref[...] = emb_ref[...]

    h = h_ref[...]                                       # [B*S, H] f32

    # packed small per-layer operands: one (8, 128) f32 block, static slices
    sm = small_ref[...]
    bqkv = sm[0:1, :3 * H]
    bo = sm[1:2, :H]
    ln1g = sm[2:3, :H]
    ln1b = sm[3:4, :H]
    b1 = sm[4:5, :I]
    b2 = sm[5:6, :H]
    ln2g = sm[6:7, :H]
    ln2b = sm[7:8, :H]

    # --- self attention: fused QKV projection (1/sqrt(dh) folded into Q cols) ---
    qkv = dense(h, wqkv_ref[...], bqkv)                  # [B*S, 3H] f32

    def head_major(off):
        # [B*S, 3H] -> [nH*B, S, dh]: heads become the contraction batch dim
        cols = [qkv[:, off + hh * dh: off + (hh + 1) * dh] for hh in range(nH)]
        return jnp.stack(cols, axis=0).reshape(nH * B, S, dh).astype(bf16)

    q = head_major(0)
    k = head_major(H)
    v = head_major(2 * H)

    # single batched contraction over all (head, batch) pairs
    s = jnp.einsum("bqd,bkd->bqk", q, k,
                   preferred_element_type=f32) + mask_ref[...]   # [nH*B, S, S]
    m = jnp.max(s, axis=-1, keepdims=True)
    p = jnp.exp(s - m)                                   # softmax kept in f32
    p = p * pl.reciprocal(jnp.sum(p, axis=-1, keepdims=True), approx=True)
    ctx = jnp.einsum("bqk,bkd->bqd", p.astype(bf16), v,
                     preferred_element_type=f32)          # [nH*B, S, dh]

    # fold heads back through the output projection: no lane concatenate
    ctx = ctx.reshape(nH, B * S, dh).astype(bf16)
    wo3 = wo_ref[...].reshape(nH, dh, H)
    attn = jnp.einsum("htd,hdo->hto", ctx, wo3,
                      preferred_element_type=f32).sum(axis=0) + bo   # [B*S, H]

    h = layernorm(attn + h, ln1g, ln1b)

    # --- FFN ---
    f = dense(h, w1_ref[...], b1)
    # TODO(synk): tanh-approx GELU (HF "gelu_new"); switch to erf-exact if the
    # reference checkpoint uses hidden_act="gelu".
    f = 0.5 * f * (1.0 + jnp.tanh(0.7978845608028654 * (f + 0.044715 * f * f * f)))
    f = dense(f, w2_ref[...], b2)
    h = layernorm(f + h, ln2g, ln2b)
    h_ref[...] = h                                       # carry to next layer

    # --- last step: pooler (first-token dense + tanh) + classifier ---
    @pl.when(layer == pl.num_programs(0) - 1)
    def _():
        rows = ((B + 7) // 8) * 8
        first = h.reshape(B, S, H)[:, 0, :]              # [B, H]
        if rows > B:                                     # pad to a dense (8,128) store
            first = jnp.concatenate(
                [first, jnp.zeros((rows - B, H), f32)], axis=0)
        pooled = jnp.tanh(dense(first, poolw_ref[...], pcb_ref[0:1, :H]))
        # Dropout(0.1) is identity at inference (eval mode).
        logits_ref[...] = dense(pooled, clsw_ref[...], pcb_ref[1:2, :])


def _build_fused_call(cfg, B, S):
    H, I, L = cfg.hidden_size, cfg.intermediate_size, cfg.num_layers
    nH = cfg.num_heads
    dh = H // nH
    out_rows = ((B + 7) // 8) * 8

    kern = functools.partial(_fused_cls_kernel, B=B, S=S, nH=nH, dh=dh, I=I)

    def shared2(r, c):
        return pl.BlockSpec((r, c), lambda l: (0, 0))

    def shared3(a, r, c):
        return pl.BlockSpec((a, r, c), lambda l: (0, 0, 0))

    def per_layer(r, c):
        return pl.BlockSpec((None, r, c), lambda l: (l, 0, 0))

    grid_spec = pltpu.PrefetchScalarGridSpec(
        num_scalar_prefetch=0,
        grid=(L,),
        in_specs=[
            shared2(B * S, H),            # post-LN embeddings (seed of resident h)
            shared3(nH * B, 1, S),        # additive attention mask, head-major batch
            per_layer(H, 3 * H),          # fused QKV weight (bf16, Q pre-scaled)
            per_layer(H, H),              # attention output weight (bf16)
            per_layer(H, I),              # FFN W1 (bf16)
            per_layer(I, H),              # FFN W2 (bf16)
            per_layer(8, 128),            # packed small per-layer operands (f32)
            shared2(H, H),                # pooler weight (bf16)
            shared2(H, CLS_PAD),          # classifier weight, lane-padded (bf16)
            shared2(2, CLS_PAD),          # packed pooler bias / classifier bias
        ],
        out_specs=pl.BlockSpec((out_rows, CLS_PAD), lambda l: (0, 0)),
        scratch_shapes=[pltpu.VMEM((B * S, H), jnp.float32)],
    )

    return pl.pallas_call(
        kern,
        out_shape=jax.ShapeDtypeStruct((out_rows, CLS_PAD), jnp.float32),
        grid_spec=grid_spec,
        compiler_params=pltpu.CompilerParams(
            dimension_semantics=("arbitrary",),    # layer loop carries VMEM state
            vmem_limit_bytes=32 * 1024 * 1024,     # explicit budget (v7x-safe)
        ),
    )


# --------------------------- params & forward ---------------------------

def init_params(key, cfg):
    """Natural BERT-like parameters (f32, per-tensor), mirroring the PyTorch module."""
    keys = iter(jax.random.split(key, 32))

    def nrm(shape):
        return (0.02 * jax.random.normal(next(keys), shape)).astype(jnp.float32)

    H, I, L, C = cfg.hidden_size, cfg.intermediate_size, cfg.num_layers, cfg.class_num
    return {
        "word_emb": nrm((cfg.vocab_size, H)),
        "pos_emb": nrm((cfg.max_position, H)),
        "type_emb": nrm((cfg.type_vocab_size, H)),
        "emb_ln_g": jnp.ones((H,), jnp.float32),
        "emb_ln_b": jnp.zeros((H,), jnp.float32),
        "wq": nrm((L, H, H)), "bq": jnp.zeros((L, H), jnp.float32),
        "wk": nrm((L, H, H)), "bk": jnp.zeros((L, H), jnp.float32),
        "wv": nrm((L, H, H)), "bv": jnp.zeros((L, H), jnp.float32),
        "wo": nrm((L, H, H)), "bo": jnp.zeros((L, H), jnp.float32),
        "ln1_g": jnp.ones((L, H), jnp.float32), "ln1_b": jnp.zeros((L, H), jnp.float32),
        "w1": nrm((L, H, I)), "b1": jnp.zeros((L, I), jnp.float32),
        "w2": nrm((L, I, H)), "b2": jnp.zeros((L, H), jnp.float32),
        "ln2_g": jnp.ones((L, H), jnp.float32), "ln2_b": jnp.zeros((L, H), jnp.float32),
        "pool_w": nrm((H, H)), "pool_b": jnp.zeros((H,), jnp.float32),
        "cls_w": nrm((H, C)), "cls_b": jnp.zeros((C,), jnp.float32),
    }


def pack_params(params, cfg):
    """One-time kernel-ready weight prep (outside the jitted forward):
    QKV fusion with 1/sqrt(dh) folded into Q, bf16 casts, small-operand packing,
    classifier lane-padding."""
    H, I, L, C = cfg.hidden_size, cfg.intermediate_size, cfg.num_layers, cfg.class_num
    nH = cfg.num_heads
    dh = H // nH
    bf16 = jnp.bfloat16
    scale = 1.0 / math.sqrt(dh)

    wqkv = jnp.concatenate([params["wq"] * scale, params["wk"], params["wv"]], axis=-1)
    bqkv = jnp.concatenate([params["bq"] * scale, params["bk"], params["bv"]], axis=-1)

    def row(x, width):                       # pad an (L, width) vector to 128 lanes
        return jnp.pad(x, ((0, 0), (0, 128 - width)))

    small = jnp.stack([
        row(bqkv, 3 * H),
        row(params["bo"], H),
        row(params["ln1_g"], H),
        row(params["ln1_b"], H),
        row(params["b1"], I),
        row(params["b2"], H),
        row(params["ln2_g"], H),
        row(params["ln2_b"], H),
    ], axis=1).astype(jnp.float32)           # (L, 8, 128)

    cls_w = jnp.zeros((H, CLS_PAD), jnp.float32).at[:, :C].set(params["cls_w"])
    pcb = jnp.zeros((2, CLS_PAD), jnp.float32)
    pcb = pcb.at[0, :H].set(params["pool_b"])
    pcb = pcb.at[1, :C].set(params["cls_b"])

    return {
        "word_emb": params["word_emb"],
        "pos_emb": params["pos_emb"],
        "type_emb": params["type_emb"],
        "emb_ln_g": params["emb_ln_g"],
        "emb_ln_b": params["emb_ln_b"],
        "wqkv": wqkv.astype(bf16),
        "wo": params["wo"].astype(bf16),
        "w1": params["w1"].astype(bf16),
        "w2": params["w2"].astype(bf16),
        "small": small,
        "pool_w": params["pool_w"].astype(bf16),
        "cls_w": cls_w.astype(bf16),
        "pcb": pcb,
    }


@functools.partial(jax.jit, static_argnums=(1,))
def cls_model_forward(pp, cfg, input_ids, attention_mask, token_type_ids):
    B, S = input_ids.shape
    H, nH, C = cfg.hidden_size, cfg.num_heads, cfg.class_num

    # --- BERT embeddings: table gathers + embedding LayerNorm as plain-JAX glue ---
    emb = (jnp.take(pp["word_emb"], input_ids, axis=0)
           + pp["pos_emb"][None, :S, :]
           + jnp.take(pp["type_emb"], token_type_ids, axis=0)).astype(jnp.float32)
    mu = jnp.mean(emb, axis=-1, keepdims=True)
    var = jnp.mean(jnp.square(emb - mu), axis=-1, keepdims=True)
    emb = (emb - mu) * jax.lax.rsqrt(var + 1e-12) * pp["emb_ln_g"] + pp["emb_ln_b"]
    emb = emb.reshape(B * S, H)

    # additive mask replicated per head (matches the kernel's head-major batch order)
    add = ((1.0 - attention_mask.astype(jnp.float32)) * -1e9)[:, None, :]    # (B,1,S)
    mask_hb = jnp.broadcast_to(add[None], (nH, B, 1, S)).reshape(nH * B, 1, S)

    fused = _build_fused_call(cfg, B, S)
    logits_pad = fused(
        emb, mask_hb,
        pp["wqkv"], pp["wo"], pp["w1"], pp["w2"], pp["small"],
        pp["pool_w"], pp["cls_w"], pp["pcb"],
    )
    return logits_pad[:B, :C]


# ---------------------------------- main ----------------------------------

if __name__ == "__main__":
    cfg = Config()
    key = jax.random.PRNGKey(0)
    pkey, ikey = jax.random.split(key)

    params = init_params(pkey, cfg)
    packed = pack_params(params, cfg)     # one-time weight prep (bf16, fuse, pack, pad)

    B, S = 2, 8
    input_ids = jax.random.randint(ikey, (B, S), 0, cfg.vocab_size, dtype=jnp.int32)
    attention_mask = jnp.ones((B, S), dtype=jnp.int32).at[1, 6:].set(0)  # pad tail of 2nd seq
    token_type_ids = jnp.zeros((B, S), dtype=jnp.int32)

    logits = cls_model_forward(packed, cfg, input_ids, attention_mask, token_type_ids)
    logits = jax.block_until_ready(logits)
    assert logits.shape == (B, cfg.class_num)
    print("KERNEL_OK")
</pallas_src>

<mosaic_0001>
module attributes {stable_mosaic.version = 11 : i64} {
  func.func @_fused_cls_kernel(%arg0: i32, %arg1: memref<16x32xf32, #tpu.memory_space<vmem>>, %arg2: memref<4x1x8xf32, #tpu.memory_space<vmem>>, %arg3: memref<1x32x96xbf16, #tpu.memory_space<vmem>>, %arg4: memref<1x32x32xbf16, #tpu.memory_space<vmem>>, %arg5: memref<1x32x64xbf16, #tpu.memory_space<vmem>>, %arg6: memref<1x64x32xbf16, #tpu.memory_space<vmem>>, %arg7: memref<1x8x128xf32, #tpu.memory_space<vmem>>, %arg8: memref<32x32xbf16, #tpu.memory_space<vmem>>, %arg9: memref<32x128xbf16, #tpu.memory_space<vmem>>, %arg10: memref<2x128xf32, #tpu.memory_space<vmem>>, %arg11: memref<8x128xf32, #tpu.memory_space<vmem>>, %arg12: memref<16x32xf32, #tpu.memory_space<vmem>>) attributes {dimension_semantics = [#tpu.dimension_semantics<arbitrary>], iteration_bounds = array<i64: 2>, scalar_prefetch = 0 : i64, scratch_operands = 1 : i64, tpu.core_type = #tpu.core_type<tc>, window_params = [{pipeline_mode = #tpu.pipeline_mode<synchronous>, transform_indices = @transform_0, window_bounds = array<i64: 16, 32>}, {pipeline_mode = #tpu.pipeline_mode<synchronous>, transform_indices = @transform_1, window_bounds = array<i64: 4, 1, 8>}, {transform_indices = @transform_2, window_bounds = array<i64: 1, 32, 96>}, {transform_indices = @transform_3, window_bounds = array<i64: 1, 32, 32>}, {transform_indices = @transform_4, window_bounds = array<i64: 1, 32, 64>}, {transform_indices = @transform_5, window_bounds = array<i64: 1, 64, 32>}, {transform_indices = @transform_6, window_bounds = array<i64: 1, 8, 128>}, {pipeline_mode = #tpu.pipeline_mode<synchronous>, transform_indices = @transform_7, window_bounds = array<i64: 32, 32>}, {pipeline_mode = #tpu.pipeline_mode<synchronous>, transform_indices = @transform_8, window_bounds = array<i64: 32, 128>}, {pipeline_mode = #tpu.pipeline_mode<synchronous>, transform_indices = @transform_9, window_bounds = array<i64: 2, 128>}, {pipeline_mode = #tpu.pipeline_mode<synchronous>, transform_indices = @transform_10, window_bounds = array<i64: 8, 128>}]} {
    %c0_i32 = arith.constant 0 : i32
    %0 = arith.cmpi eq, %arg0, %c0_i32 : i32
    %1 = arith.extui %0 : i1 to i32
    %c0_i32_0 = arith.constant 0 : i32
    %2 = arith.cmpi ne, %1, %c0_i32_0 : i32
    scf.if %2 {
      %c0_45 = arith.constant 0 : index
      %c0_46 = arith.constant 0 : index
      %141 = vector.load %arg1[%c0_45, %c0_46] : memref<16x32xf32, #tpu.memory_space<vmem>>, vector<16x32xf32>
      %c0_47 = arith.constant 0 : index
      %c0_48 = arith.constant 0 : index
      %142 = vector.load %arg12[%c0_47, %c0_48] : memref<16x32xf32, #tpu.memory_space<vmem>>, vector<16x32xf32>
      tpu.vector_store %arg12[%c0_47, %c0_48], %141 {strides = array<i32>} : memref<16x32xf32, #tpu.memory_space<vmem>>, vector<16x32xf32>,
    } else {
    }
    %c0 = arith.constant 0 : index
    %c0_1 = arith.constant 0 : index
    %3 = vector.load %arg12[%c0, %c0_1] : memref<16x32xf32, #tpu.memory_space<vmem>>, vector<16x32xf32>
    %c0_2 = arith.constant 0 : index
    %c0_3 = arith.constant 0 : index
    %c0_4 = arith.constant 0 : index
    %4 = vector.load %arg7[%c0_2, %c0_3, %c0_4] : memref<1x8x128xf32, #tpu.memory_space<vmem>>, vector<1x8x128xf32>
    %5 = vector.shape_cast %4 : vector<1x8x128xf32> to vector<8x128xf32>
    %6 = vector.extract_strided_slice %5 {offsets = [0, 0], sizes = [1, 96], strides = [1, 1]} : vector<8x128xf32> to vector<1x96xf32>
    %7 = vector.extract_strided_slice %5 {offsets = [1, 0], sizes = [1, 32], strides = [1, 1]} : vector<8x128xf32> to vector<1x32xf32>
    %8 = vector.extract_strided_slice %5 {offsets = [2, 0], sizes = [1, 32], strides = [1, 1]} : vector<8x128xf32> to vector<1x32xf32>
    %9 = vector.extract_strided_slice %5 {offsets = [3, 0], sizes = [1, 32], strides = [1, 1]} : vector<8x128xf32> to vector<1x32xf32>
    %10 = vector.extract_strided_slice %5 {offsets = [4, 0], sizes = [1, 64], strides = [1, 1]} : vector<8x128xf32> to vector<1x64xf32>
    %11 = vector.extract_strided_slice %5 {offsets = [5, 0], sizes = [1, 32], strides = [1, 1]} : vector<8x128xf32> to vector<1x32xf32>
    %12 = vector.extract_strided_slice %5 {offsets = [6, 0], sizes = [1, 32], strides = [1, 1]} : vector<8x128xf32> to vector<1x32xf32>
    %13 = vector.extract_strided_slice %5 {offsets = [7, 0], sizes = [1, 32], strides = [1, 1]} : vector<8x128xf32> to vector<1x32xf32>
    %c0_5 = arith.constant 0 : index
    %c0_6 = arith.constant 0 : index
    %c0_7 = arith.constant 0 : index
    %14 = vector.load %arg3[%c0_5, %c0_6, %c0_7] : memref<1x32x96xbf16, #tpu.memory_space<vmem>>, vector<1x32x96xbf16>
    %15 = vector.shape_cast %14 : vector<1x32x96xbf16> to vector<32x96xbf16>
    %16 = arith.truncf %3 : vector<16x32xf32> to vector<16x32xbf16>
    %cst = arith.constant dense<0.000000e+00> : vector<16x96xf32>
    %17 = tpu.matmul %16, %15, %cst {dimension_numbers = #tpu.dot_dimension_numbers<[1], [0], [0], [1], [0, 0, 1, 1], [], []>} : vector<16x32xbf16>, vector<32x96xbf16>, vector<16x96xf32> -> vector<16x96xf32>
    %18 = vector.broadcast %6 : vector<1x96xf32> to vector<16x96xf32>
    %19 = arith.addf %17, %18 : vector<16x96xf32>
    %20 = vector.extract_strided_slice %19 {offsets = [0, 0], sizes = [16, 16], strides = [1, 1]} : vector<16x96xf32> to vector<16x16xf32>
    %21 = vector.extract_strided_slice %19 {offsets = [0, 16], sizes = [16, 16], strides = [1, 1]} : vector<16x96xf32> to vector<16x16xf32>
    %22 = vector.shape_cast %20 : vector<16x16xf32> to vector<1x16x16xf32>
    %23 = vector.shape_cast %21 : vector<16x16xf32> to vector<1x16x16xf32>
    %24 = tpu.concatenate %22, %23 in 0 : vector<1x16x16xf32>, vector<1x16x16xf32> -> vector<2x16x16xf32>
    %25 = vector.shape_cast %24 : vector<2x16x16xf32> to vector<4x8x16xf32>
    %26 = arith.truncf %25 : vector<4x8x16xf32> to vector<4x8x16xbf16>
    %27 = vector.extract_strided_slice %19 {offsets = [0, 32], sizes = [16, 16], strides = [1, 1]} : vector<16x96xf32> to vector<16x16xf32>
    %28 = vector.extract_strided_slice %19 {offsets = [0, 48], sizes = [16, 16], strides = [1, 1]} : vector<16x96xf32> to vector<16x16xf32>
    %29 = vector.shape_cast %27 : vector<16x16xf32> to vector<1x16x16xf32>
    %30 = vector.shape_cast %28 : vector<16x16xf32> to vector<1x16x16xf32>
    %31 = tpu.concatenate %29, %30 in 0 : vector<1x16x16xf32>, vector<1x16x16xf32> -> vector<2x16x16xf32>
    %32 = vector.shape_cast %31 : vector<2x16x16xf32> to vector<4x8x16xf32>
    %33 = arith.truncf %32 : vector<4x8x16xf32> to vector<4x8x16xbf16>
    %34 = vector.extract_strided_slice %19 {offsets = [0, 64], sizes = [16, 16], strides = [1, 1]} : vector<16x96xf32> to vector<16x16xf32>
    %35 = vector.extract_strided_slice %19 {offsets = [0, 80], sizes = [16, 16], strides = [1, 1]} : vector<16x96xf32> to vector<16x16xf32>
    %36 = vector.shape_cast %34 : vector<16x16xf32> to vector<1x16x16xf32>
    %37 = vector.shape_cast %35 : vector<16x16xf32> to vector<1x16x16xf32>
    %38 = tpu.concatenate %36, %37 in 0 : vector<1x16x16xf32>, vector<1x16x16xf32> -> vector<2x16x16xf32>
    %39 = vector.shape_cast %38 : vector<2x16x16xf32> to vector<4x8x16xf32>
    %40 = arith.truncf %39 : vector<4x8x16xf32> to vector<4x8x16xbf16>
    "tpu.trace_start"() <{level = 10 : i32, message = "bqd,bkd->bqk"}> : () -> ()
    %cst_8 = arith.constant dense<0.000000e+00> : vector<4x8x8xf32>
    %41 = tpu.matmul %26, %33, %cst_8 {dimension_numbers = #tpu.dot_dimension_numbers<[2], [2], [1], [1], [0, 0, 0, 1, 1, 1], [0], [0]>} : vector<4x8x16xbf16>, vector<4x8x16xbf16>, vector<4x8x8xf32> -> vector<4x8x8xf32>
    "tpu.trace_stop"() : () -> ()
    %c0_9 = arith.constant 0 : index
    %c0_10 = arith.constant 0 : index
    %c0_11 = arith.constant 0 : index
    %42 = vector.load %arg2[%c0_9, %c0_10, %c0_11] : memref<4x1x8xf32, #tpu.memory_space<vmem>>, vector<4x1x8xf32>
    %43 = vector.broadcast %42 : vector<4x1x8xf32> to vector<4x8x8xf32>
    %44 = arith.addf %41, %43 : vector<4x8x8xf32>
    %cst_12 = arith.constant dense<0xFF800000> : vector<4x8xf32>
    %45 = vector.multi_reduction <maximumf>, %44, %cst_12 [2] : vector<4x8x8xf32> to vector<4x8xf32>
    %46 = vector.shape_cast %45 : vector<4x8xf32> to vector<4x8x1xf32>
    %47 = vector.broadcast %46 : vector<4x8x1xf32> to vector<4x8x8xf32>
    %48 = arith.subf %44, %47 : vector<4x8x8xf32>
    %49 = math.exp %48 : vector<4x8x8xf32>
    %cst_13 = arith.constant dense<0.000000e+00> : vector<4x8xf32>
    %50 = vector.multi_reduction <add>, %49, %cst_13 [2] : vector<4x8x8xf32> to vector<4x8xf32>
    %51 = vector.shape_cast %50 : vector<4x8xf32> to vector<4x8x1xf32>
    %52 = tpu.reciprocal %51 {approx = true} : vector<4x8x1xf32> -> vector<4x8x1xf32>
    %53 = vector.broadcast %52 : vector<4x8x1xf32> to vector<4x8x8xf32>
    %54 = arith.mulf %49, %53 : vector<4x8x8xf32>
    %55 = arith.truncf %54 : vector<4x8x8xf32> to vector<4x8x8xbf16>
    "tpu.trace_start"() <{level = 10 : i32, message = "bqk,bkd->bqd"}> : () -> ()
    %cst_14 = arith.constant dense<0.000000e+00> : vector<4x8x16xf32>
    %56 = tpu.matmul %55, %40, %cst_14 {dimension_numbers = #tpu.dot_dimension_numbers<[2], [1], [1], [2], [0, 0, 0, 1, 1, 2], [0], [0]>} : vector<4x8x8xbf16>, vector<4x8x16xbf16>, vector<4x8x16xf32> -> vector<4x8x16xf32>
    "tpu.trace_stop"() : () -> ()
    %57 = vector.shape_cast %56 : vector<4x8x16xf32> to vector<2x16x16xf32>
    %58 = arith.truncf %57 : vector<2x16x16xf32> to vector<2x16x16xbf16>
    %c0_15 = arith.constant 0 : index
    %c0_16 = arith.constant 0 : index
    %c0_17 = arith.constant 0 : index
    %59 = vector.load %arg4[%c0_15, %c0_16, %c0_17] : memref<1x32x32xbf16, #tpu.memory_space<vmem>>, vector<1x32x32xbf16>
    %60 = vector.shape_cast %59 : vector<1x32x32xbf16> to vector<32x32xbf16>
    %61 = vector.shape_cast %60 : vector<32x32xbf16> to vector<2x16x32xbf16>
    "tpu.trace_start"() <{level = 10 : i32, message = "htd,hdo->hto"}> : () -> ()
    %cst_18 = arith.constant dense<0.000000e+00> : vector<2x16x32xf32>
    %62 = tpu.matmul %58, %61, %cst_18 {dimension_numbers = #tpu.dot_dimension_numbers<[2], [1], [1], [2], [0, 0, 0, 1, 1, 2], [0], [0]>} : vector<2x16x16xbf16>, vector<2x16x32xbf16>, vector<2x16x32xf32> -> vector<2x16x32xf32>
    "tpu.trace_stop"() : () -> ()
    %cst_19 = arith.constant dense<0.000000e+00> : vector<16x32xf32>
    %63 = vector.multi_reduction <add>, %62, %cst_19 [0] : vector<2x16x32xf32> to vector<16x32xf32>
    %64 = vector.broadcast %7 : vector<1x32xf32> to vector<16x32xf32>
    %65 = arith.addf %63, %64 : vector<16x32xf32>
    %66 = arith.addf %65, %3 : vector<16x32xf32>
    %cst_20 = arith.constant dense<0.000000e+00> : vector<16xf32>
    %67 = vector.multi_reduction <add>, %66, %cst_20 [1] : vector<16x32xf32> to vector<16xf32>
    %68 = vector.shape_cast %67 : vector<16xf32> to vector<16x1xf32>
    %cst_21 = arith.constant 3.200000e+01 : f32
    %69 = vector.broadcast %cst_21 : f32 to vector<16x1xf32>
    %70 = arith.divf %68, %69 : vector<16x1xf32>
    %71 = arith.mulf %66, %66 : vector<16x32xf32>
    %cst_22 = arith.constant dense<0.000000e+00> : vector<16xf32>
    %72 = vector.multi_reduction <add>, %71, %cst_22 [1] : vector<16x32xf32> to vector<16xf32>
    %73 = vector.shape_cast %72 : vector<16xf32> to vector<16x1xf32>
    %cst_23 = arith.constant 3.200000e+01 : f32
    %74 = vector.broadcast %cst_23 : f32 to vector<16x1xf32>
    %75 = arith.divf %73, %74 : vector<16x1xf32>
    %76 = arith.mulf %70, %70 : vector<16x1xf32>
    %77 = arith.subf %75, %76 : vector<16x1xf32>
    %78 = vector.broadcast %70 : vector<16x1xf32> to vector<16x32xf32>
    %79 = arith.subf %66, %78 : vector<16x32xf32>
    %cst_24 = arith.constant 9.99999996E-13 : f32
    %80 = vector.broadcast %cst_24 : f32 to vector<16x1xf32>
    %81 = arith.addf %77, %80 : vector<16x1xf32>
    %82 = math.rsqrt %81 : vector<16x1xf32>
    %83 = vector.broadcast %82 : vector<16x1xf32> to vector<16x32xf32>
    %84 = arith.mulf %79, %83 : vector<16x32xf32>
    %85 = vector.broadcast %8 : vector<1x32xf32> to vector<16x32xf32>
    %86 = arith.mulf %84, %85 : vector<16x32xf32>
    %87 = vector.broadcast %9 : vector<1x32xf32> to vector<16x32xf32>
    %88 = arith.addf %86, %87 : vector<16x32xf32>
    %c0_25 = arith.constant 0 : index
    %c0_26 = arith.constant 0 : index
    %c0_27 = arith.constant 0 : index
    %89 = vector.load %arg5[%c0_25, %c0_26, %c0_27] : memref<1x32x64xbf16, #tpu.memory_space<vmem>>, vector<1x32x64xbf16>
    %90 = vector.shape_cast %89 : vector<1x32x64xbf16> to vector<32x64xbf16>
    %91 = arith.truncf %88 : vector<16x32xf32> to vector<16x32xbf16>
    %cst_28 = arith.constant dense<0.000000e+00> : vector<16x64xf32>
    %92 = tpu.matmul %91, %90, %cst_28 {dimension_numbers = #tpu.dot_dimension_numbers<[1], [0], [0], [1], [0, 0, 1, 1], [], []>} : vector<16x32xbf16>, vector<32x64xbf16>, vector<16x64xf32> -> vector<16x64xf32>
    %93 = vector.broadcast %10 : vector<1x64xf32> to vector<16x64xf32>
    %94 = arith.addf %92, %93 : vector<16x64xf32>
    %cst_29 = arith.constant 5.000000e-01 : f32
    %95 = vector.broadcast %cst_29 : f32 to vector<16x64xf32>
    %96 = arith.mulf %95, %94 : vector<16x64xf32>
    %cst_30 = arith.constant 4.471500e-02 : f32
    %97 = vector.broadcast %cst_30 : f32 to vector<16x64xf32>
    %98 = arith.mulf %97, %94 : vector<16x64xf32>
    %99 = arith.mulf %98, %94 : vector<16x64xf32>
    %100 = arith.mulf %99, %94 : vector<16x64xf32>
    %101 = arith.addf %94, %100 : vector<16x64xf32>
    %cst_31 = arith.constant 0.797884583 : f32
    %102 = vector.broadcast %cst_31 : f32 to vector<16x64xf32>
    %103 = arith.mulf %102, %101 : vector<16x64xf32>
    %104 = math.tanh %103 : vector<16x64xf32>
    %cst_32 = arith.constant 1.000000e+00 : f32
    %105 = vector.broadcast %cst_32 : f32 to vector<16x64xf32>
    %106 = arith.addf %105, %104 : vector<16x64xf32>
    %107 = arith.mulf %96, %106 : vector<16x64xf32>
    %c0_33 = arith.constant 0 : index
    %c0_34 = arith.constant 0 : index
    %c0_35 = arith.constant 0 : index
    %108 = vector.load %arg6[%c0_33, %c0_34, %c0_35] : memref<1x64x32xbf16, #tpu.memory_space<vmem>>, vector<1x64x32xbf16>
    %109 = vector.shape_cast %108 : vector<1x64x32xbf16> to vector<64x32xbf16>
    %110 = arith.truncf %107 : vector<16x64xf32> to vector<16x64xbf16>
    %cst_36 = arith.constant dense<0.000000e+00> : vector<16x32xf32>
    %111 = tpu.matmul %110, %109, %cst_36 {dimension_numbers = #tpu.dot_dimension_numbers<[1], [0], [0], [1], [0, 0, 1, 1], [], []>} : vector<16x64xbf16>, vector<64x32xbf16>, vector<16x32xf32> -> vector<16x32xf32>
    %112 = vector.broadcast %11 : vector<1x32xf32> to vector<16x32xf32>
    %113 = arith.addf %111, %112 : vector<16x32xf32>
    %114 = arith.addf %113, %88 : vector<16x32xf32>
    %cst_37 = arith.constant dense<0.000000e+00> : vector<16xf32>
    %115 = vector.multi_reduction <add>, %114, %cst_37 [1] : vector<16x32xf32> to vector<16xf32>
    %116 = vector.shape_cast %115 : vector<16xf32> to vector<16x1xf32>
    %cst_38 = arith.constant 3.200000e+01 : f32
    %117 = vector.broadcast %cst_38 : f32 to vector<16x1xf32>
    %118 = arith.divf %116, %117 : vector<16x1xf32>
    %119 = arith.mulf %114, %114 : vector<16x32xf32>
    %cst_39 = arith.constant dense<0.000000e+00> : vector<16xf32>
    %120 = vector.multi_reduction <add>, %119, %cst_39 [1] : vector<16x32xf32> to vector<16xf32>
    %121 = vector.shape_cast %120 : vector<16xf32> to vector<16x1xf32>
    %cst_40 = arith.constant 3.200000e+01 : f32
    %122 = vector.broadcast %cst_40 : f32 to vector<16x1xf32>
    %123 = arith.divf %121, %122 : vector<16x1xf32>
    %124 = arith.mulf %118, %118 : vector<16x1xf32>
    %125 = arith.subf %123, %124 : vector<16x1xf32>
    %126 = vector.broadcast %118 : vector<16x1xf32> to vector<16x32xf32>
    %127 = arith.subf %114, %126 : vector<16x32xf32>
    %cst_41 = arith.constant 9.99999996E-13 : f32
    %128 = vector.broadcast %cst_41 : f32 to vector<16x1xf32>
    %129 = arith.addf %125, %128 : vector<16x1xf32>
    %130 = math.rsqrt %129 : vector<16x1xf32>
    %131 = vector.broadcast %130 : vector<16x1xf32> to vector<16x32xf32>
    %132 = arith.mulf %127, %131 : vector<16x32xf32>
    %133 = vector.broadcast %12 : vector<1x32xf32> to vector<16x32xf32>
    %134 = arith.mulf %132, %133 : vector<16x32xf32>
    %135 = vector.broadcast %13 : vector<1x32xf32> to vector<16x32xf32>
    %136 = arith.addf %134, %135 : vector<16x32xf32>
    %c0_42 = arith.constant 0 : index
    %c0_43 = arith.constant 0 : index
    %137 = vector.load %arg12[%c0_42, %c0_43] : memref<16x32xf32, #tpu.memory_space<vmem>>, vector<16x32xf32>
    tpu.vector_store %arg12[%c0_42, %c0_43], %136 {strides = array<i32>} : memref<16x32xf32, #tpu.memory_space<vmem>>, vector<16x32xf32>,
    %c1_i32 = arith.constant 1 : i32
    %138 = arith.cmpi eq, %arg0, %c1_i32 : i32
    %139 = arith.extui %138 : i1 to i32
    %c0_i32_44 = arith.constant 0 : i32
    %140 = arith.cmpi ne, %139, %c0_i32_44 : i32
    scf.if %140 {
      %141 = vector.shape_cast %136 : vector<16x32xf32> to vector<2x8x32xf32>
      %142 = vector.extract_strided_slice %141 {offsets = [0, 0, 0], sizes = [2, 1, 32], strides = [1, 1, 1]} : vector<2x8x32xf32> to vector<2x1x32xf32>
      %143 = vector.shape_cast %142 : vector<2x1x32xf32> to vector<2x32xf32>
      %cst_45 = arith.constant 0.000000e+00 : f32
      %144 = vector.broadcast %cst_45 : f32 to vector<6x32xf32>
      %145 = tpu.concatenate %143, %144 in 0 : vector<2x32xf32>, vector<6x32xf32> -> vector<8x32xf32>
      %c0_46 = arith.constant 0 : index
      %c0_47 = arith.constant 0 : index
      %146 = vector.load %arg8[%c0_46, %c0_47] : memref<32x32xbf16, #tpu.memory_space<vmem>>, vector<32x32xbf16>
      %c0_48 = arith.constant 0 : index
      %c0_49 = arith.constant 0 : index
      %147 = vector.load %arg10[%c0_48, %c0_49] : memref<2x128xf32, #tpu.memory_space<vmem>>, vector<1x32xf32>
      %148 = arith.truncf %145 : vector<8x32xf32> to vector<8x32xbf16>
      %cst_50 = arith.constant dense<0.000000e+00> : vector<8x32xf32>
      %149 = tpu.matmul %148, %146, %cst_50 {dimension_numbers = #tpu.dot_dimension_numbers<[1], [0], [0], [1], [0, 0, 1, 1], [], []>} : vector<8x32xbf16>, vector<32x32xbf16>, vector<8x32xf32> -> vector<8x32xf32>
      %150 = vector.broadcast %147 : vector<1x32xf32> to vector<8x32xf32>
      %151 = arith.addf %149, %150 : vector<8x32xf32>
      %152 = math.tanh %151 : vector<8x32xf32>
      %c0_51 = arith.constant 0 : index
      %c0_52 = arith.constant 0 : index
      %153 = vector.load %arg9[%c0_51, %c0_52] : memref<32x128xbf16, #tpu.memory_space<vmem>>, vector<32x128xbf16>
      %c1 = arith.constant 1 : index
      %c0_53 = arith.constant 0 : index
      %154 = vector.load %arg10[%c1, %c0_53] : memref<2x128xf32, #tpu.memory_space<vmem>>, vector<1x128xf32>
      %155 = arith.truncf %152 : vector<8x32xf32> to vector<8x32xbf16>
      %cst_54 = arith.constant dense<0.000000e+00> : vector<8x128xf32>
      %156 = tpu.matmul %155, %153, %cst_54 {dimension_numbers = #tpu.dot_dimension_numbers<[1], [0], [0], [1], [0, 0, 1, 1], [], []>} : vector<8x32xbf16>, vector<32x128xbf16>, vector<8x128xf32> -> vector<8x128xf32>
      %157 = vector.broadcast %154 : vector<1x128xf32> to vector<8x128xf32>
      %158 = arith.addf %156, %157 : vector<8x128xf32>
      %c0_55 = arith.constant 0 : index
      %c0_56 = arith.constant 0 : index
      %159 = vector.load %arg11[%c0_55, %c0_56] : memref<8x128xf32, #tpu.memory_space<vmem>>, vector<8x128xf32>
      tpu.vector_store %arg11[%c0_55, %c0_56], %158 {strides = array<i32>} : memref<8x128xf32, #tpu.memory_space<vmem>>, vector<8x128xf32>,
    } else {
    }
    return
  }
  func.func @transform_0(%arg0: i32) -> (i32, i32) {
    %c0_i32 = arith.constant 0 : i32
    %c0_i32_0 = arith.constant 0 : i32
    %c0_i32_1 = arith.constant 0 : i32
    return %c0_i32, %c0_i32_0 : i32, i32
  }
  func.func @transform_1(%arg0: i32) -> (i32, i32, i32) {
    %c0_i32 = arith.constant 0 : i32
    %c0_i32_0 = arith.constant 0 : i32
    %c0_i32_1 = arith.constant 0 : i32
    %c0_i32_2 = arith.constant 0 : i32
    return %c0_i32, %c0_i32_0, %c0_i32_1 : i32, i32, i32
  }
  func.func @transform_2(%arg0: i32) -> (i32, i32, i32) {
    %c0_i32 = arith.constant 0 : i32
    %c0_i32_0 = arith.constant 0 : i32
    %c0_i32_1 = arith.constant 0 : i32
    return %arg0, %c0_i32, %c0_i32_0 : i32, i32, i32
  }
  func.func @transform_3(%arg0: i32) -> (i32, i32, i32) {
    %c0_i32 = arith.constant 0 : i32
    %c0_i32_0 = arith.constant 0 : i32
    %c0_i32_1 = arith.constant 0 : i32
    return %arg0, %c0_i32, %c0_i32_0 : i32, i32, i32
  }
  func.func @transform_4(%arg0: i32) -> (i32, i32, i32) {
    %c0_i32 = arith.constant 0 : i32
    %c0_i32_0 = arith.constant 0 : i32
    %c0_i32_1 = arith.constant 0 : i32
    return %arg0, %c0_i32, %c0_i32_0 : i32, i32, i32
  }
  func.func @transform_5(%arg0: i32) -> (i32, i32, i32) {
    %c0_i32 = arith.constant 0 : i32
    %c0_i32_0 = arith.constant 0 : i32
    %c0_i32_1 = arith.constant 0 : i32
    return %arg0, %c0_i32, %c0_i32_0 : i32, i32, i32
  }
  func.func @transform_6(%arg0: i32) -> (i32, i32, i32) {
    %c0_i32 = arith.constant 0 : i32
    %c0_i32_0 = arith.constant 0 : i32
    %c0_i32_1 = arith.constant 0 : i32
    return %arg0, %c0_i32, %c0_i32_0 : i32, i32, i32
  }
  func.func @transform_7(%arg0: i32) -> (i32, i32) {
    %c0_i32 = arith.constant 0 : i32
    %c0_i32_0 = arith.constant 0 : i32
    %c0_i32_1 = arith.constant 0 : i32
    return %c0_i32, %c0_i32_0 : i32, i32
  }
  func.func @transform_8(%arg0: i32) -> (i32, i32) {
    %c0_i32 = arith.constant 0 : i32
    %c0_i32_0 = arith.constant 0 : i32
    %c0_i32_1 = arith.constant 0 : i32
    return %c0_i32, %c0_i32_0 : i32, i32
  }
  func.func @transform_9(%arg0: i32) -> (i32, i32) {
    %c0_i32 = arith.constant 0 : i32
    %c0_i32_0 = arith.constant 0 : i32
    %c0_i32_1 = arith.constant 0 : i32
    return %c0_i32, %c0_i32_0 : i32, i32
  }
  func.func @transform_10(%arg0: i32) -> (i32, i32) {
    %c0_i32 = arith.constant 0 : i32
    %c0_i32_0 = arith.constant 0 : i32
    %c0_i32_1 = arith.constant 0 : i32
    return %c0_i32, %c0_i32_0 : i32, i32
  }
}

</mosaic_0001>

<bundles_post_ra>
// kernel: cls_model_forward.1
= control target key start
LH: loop header
LB: loop body
LE: loop exit
PB: predicated region body
PF: predicated region fallthrough
CT: control target
= control target key end

     0   :  { %s1412_s13 = smov 0   ;;  %s1591_s0 = inlined_call_operand.vmem [shape: f32[16,32], index: 0, kind: input, shape index: {}]   ;;  %s1592_s1 = inlined_call_operand.vmem [shape: f32[4,1,8], index: 1, kind: input, shape index: {}]   ;;  %s1593_s2 = inlined_call_operand.vmem [shape: bf16[2,32,96], index: 2, kind: input, shape index: {}]   ;;  %s1594_s3 = inlined_call_operand.vmem [shape: bf16[2,32,32], index: 3, kind: input, shape index: {}]   ;;  %s1595_s4 = inlined_call_operand.vmem [shape: bf16[2,32,64], index: 4, kind: input, shape index: {}]   ;;  %s1596_s5 = inlined_call_operand.vmem [shape: bf16[2,64,32], index: 5, kind: input, shape index: {}]   ;;  %s1597_s6 = inlined_call_operand.vmem [shape: f32[2,8,128], index: 6, kind: input, shape index: {}]   ;;  %s1598_s7 = inlined_call_operand.vmem [shape: bf16[32,32], index: 7, kind: input, shape index: {}]   ;;  %s1599_s8 = inlined_call_operand.vmem [shape: bf16[32,128], index: 8, kind: input, shape index: {}]   ;;  %s1600_s9 = inlined_call_operand.vmem [shape: f32[2,128], index: 9, kind: input, shape index: {}]   ;;  %s1601_s10 = inlined_call_operand.vmem [shape: f32[8,128], index: 10, kind: output, shape index: {}]  }
   0x1 LB: > { %s1418_s14 = sadd.s32 4294967295, %s1351_s13   ;;  %p1192_p0 = scmp.ge.s32.totalorder %s1351_s13, 1  ;;  %s1351_s13 = sphi %s1412_s13, %s20_s13  }
   0x2   : > { %p346_p1 = scmp.lt.s32.totalorder %s1351_s13, 3 }
   0x4   : > { %p347_p2 = pnand %p1192_p0, %p346_p1 }
   0x5   : > { %p398_p3 = scmp.lt.s32.totalorder (!%p347_p2), %s1418_s14, 1  ;;  %p1202_p4 = scmp.ne.s32.totalorder (!%p347_p2), %s1418_s14, 0 }
   0x6   : > { %350 = sbr.rel (%p347_p2) target bundleno = 1982 (0x7be), region = 60 }
   0xb   : > { %s399_s15 = scalar_select %p398_p3, %s1418_s14, 1 }
   0xd   : > { %s1277_s16 = sshll.u32 %s399_s15, 4  ;;  %s1280_s17 = sshll.u32 %s399_s15, 5 }
   0xe   : > { %s402_s20 = scalar_lea.vmem %s1593_s2, %s1277_s16  ;;  %s1430_s23 = scalar_lea.vmem %s1594_s3, %s1277_s16 }
   0xf   : > { %s1435_s26 = scalar_lea.vmem %s1595_s4, %s1277_s16  ;;  %s1440_s29 = scalar_lea.vmem %s1596_s5, %s1280_s17 }
  0x10   : > { %s1201_s30 = sshll.u32 %s399_s15, 3  ;;  %426 = sbr.rel (%p1202_p4) target bundleno = 24 (0x18), region = 64 }
  0x11   : > { %s421_s18 = scalar_lea.vmem %s1597_s6, %s1201_s30 }
  0x15   : > { %v427_v0 = vld [vmem:[%s1591_s0] sm:$0xff]  ;;  %vm429_vm0 = vcmask 261120   ;;  %v428_v1 = vld [vmem:[%s1591_s0 + $0x8] sm:$0xff] }
  0x16   : > { %430 = vst.msk [vmem:[#allocation2] sm:$0xff] %vm429_vm0, %v427_v0 }
  0x17   : > { %431 = vst.msk [vmem:[#allocation2 + $0x8] sm:$0xff] %vm429_vm0, %v428_v1 }
  0x18 PF: > { %v1282_v2 = vld [vmem:[%s402_s20 + $0x8] sm:$0xff]  ;;  %v1281_v3 = vld [vmem:[%s402_s20] sm:$0xff]  ;;  %vm453_vm1 = vcmask 261120   ;;  %s1353_s15 = smov 112   ;;  %s1354_s17 = smov 96   ;;  %vm504_vm2 = vcmask 130048  }
  0x19   : > { %463 = vmatpush.bf16.msra.mxu0 %v1282_v2  ;;  %v1459_v7 = vld [vmem:[%s421_s18] sm:$0xff]  ;;  %vm596_vm3 = vcmask 64512   ;;  %s1355_s18 = smov 64   ;;  %vm650_vm4 = vcmask 1043456   ;;  %vm953_vm12 = vcmask 523264   ;;  %p1256_p5 = scmp.ne.s32.totalorder %s1418_s14, 1 }
  0x1a   : > { %v440_v8 = vperm.slane %v1459_v7, 0  ;;  %v1307_v35 = vld [vmem:[%s1592_s1 + $0x3] ss:$0 sm:$0xff]  ;;  %v1308_v39 = vld [vmem:[%s1592_s1] ss:$0 sm:$0xff] }
  0x1b   : > { %v1309_v45 = vld [vmem:[%s1592_s1 + $0x2] ss:$0 sm:$0xff]  ;;  %v1310_v49 = vld [vmem:[%s1592_s1 + $0x1] ss:$0 sm:$0xff] }
  0x1d   : > { %v1452_v4 = vld [vmem:[#allocation2] sm:$0xff]  ;;  %464 = vmatpush.bf16.msra.mxu0 %v1281_v3 }
  0x1e   : > { %v1454_v5 = vld [vmem:[#allocation2 + $0x8] sm:$0xff] }
  0x1f   : > { %v439_v6 = vpack.c.bf16 %v1454_v5, %v1452_v4 }
  0x21   : > { %1211 = vmatmul.msk.bf16.vlgmr.msra.gmra.mxu0 %vm453_vm1, %v439_v6 }
  0x9e   : > { %v466_v9 = vpop.f32.mrf.mxu0 }
  0x9f   : > { %v467_v10 = vadd.f32 %v466_v9, %v440_v8 }
  0xa1   : > { %473 = vrot.lane.b32.xlu0 %v467_v10, %s1353_s15  ;;  %v479_v22 = vpack.c.bf16 %v467_v10, %v467_v10 }
  0xa3   : > { %v500_v25 = vunpack.c.l.b16 %v479_v22 }
  0xa5   : > { %v1468_v26 = vpack.c.b16 %v500_v25, %v500_v25 }
  0xa6   : > { %v468_v11 = vpop.f32.mrf.mxu0 }
  0xa7   : > { %v469_v12 = vadd.f32 %v468_v11, %v440_v8 }
  0xa9   : > { %475 = vrot.lane.b32.xlu0 %v469_v12, %s1353_s15  ;;  %v480_v16 = vpack.c.bf16 %v469_v12, %v469_v12 }
  0xab   : > { %v525_v20 = vunpack.c.l.b16 %v480_v16 }
  0xad   : > { %v1462_v23 = vpack.c.b16 %v525_v20, %v525_v20 }
 0x113   : > { %v474_v13 = vpop.permute.xlu0 %473 }
 0x114   : > { %v481_v14 = vpack.c.bf16 %v474_v13, %v474_v13 }
 0x116   : > { %v549_v15 = vunpack.c.l.b16 %v481_v14 }
 0x118   : > { %v550_v17 = vpack.c.b16 %v549_v15, %v549_v15 }
 0x11a   : > { %551 = vrot.lane.b32.xlu1 %v550_v17, %s1354_s17 }
 0x11b   : > { %v476_v18 = vpop.permute.xlu0 %475 }
 0x11c   : > { %v482_v19 = vpack.c.bf16 %v476_v18, %v476_v18 }
 0x11e   : > { %v573_v21 = vunpack.c.l.b16 %v482_v19 }
 0x120   : > { %v1464_v24 = vpack.c.b16 %v573_v21, %v573_v21 }
 0x122   : > { %527 = vrot.lane.b32.xlu1 %v1462_v23, %s1354_s17  ;;  %575 = vrot.lane.b32.xlu2 %v1464_v24, %s1354_s17 }
 0x12a   : > { %502 = vrot.lane.b32.xlu2 %v1468_v26, %s1354_s17 }
 0x17c   : > { %v576_v27 = vpop.permute.xlu2 %575 }
 0x17d   : > { %v581_v28 = vsel %vm504_vm2, %v576_v27, 0 }
 0x17e   : > { %590 = vmatpush.bf16.xpose.msrb.mxu0 %v581_v28 }
 0x184   : > { %v503_v29 = vpop.permute.xlu2 %502 }
 0x185   : > { %1215 = vmatmul.msk.bf16.vlgmr.msrb.gmra.mxu0 %vm504_vm2, %v482_v19  ;;  %v509_v30 = vsel %vm504_vm2, %v503_v29, 0 }
 0x186   : > { %518 = vmatpush.bf16.xpose.msra.mxu1 %v509_v30 }
 0x18c   : > { %v552_v31 = vpop.permute.xlu1 %551 }
 0x18d   : > { %1212 = vmatmul.msk.bf16.vlgmr.msra.gmra.mxu1 %vm504_vm2, %v479_v22  ;;  %v557_v32 = vsel %vm504_vm2, %v552_v31, 0 }
 0x18e   : > { %566 = vmatpush.bf16.xpose.msra.mxu3 %v557_v32 }
 0x194   : > { %v528_v33 = vpop.permute.xlu1 %527 }
 0x195   : > { %1214 = vmatmul.msk.bf16.vlgmr.msra.gmra.mxu3 %vm504_vm2, %v481_v14  ;;  %v533_v34 = vsel %vm504_vm2, %v528_v33, 0 }
 0x196   : > { %542 = vmatpush.bf16.xpose.msra.mxu2 %v533_v34 }
 0x19d   : > { %1213 = vmatmul.msk.bf16.vlgmr.msra.gmra.mxu2 %vm504_vm2, %v480_v16 }
 0x202   : > { %v592_v36 = vpop.f32.mrf.mxu0 }
 0x203   : > { %v593_v37 = vadd.f32 %v1307_v35, %v592_v36 }
 0x205   : > { %v606_v38 = vsel %vm596_vm3, %v593_v37, -inf }
 0x206   : > { %607 = vmax.xlane.f32.xlu2 %v606_v38  ;;  %v1283_v38 = vld [vmem:[%s1430_s23] sm:$0xff] }
 0x20a   : > { %v520_v40 = vpop.f32.mrf.mxu1  ;;  %v594_v41 = vpop.f32.mrf.mxu0 }
 0x20b   : > { %v521_v42 = vadd.f32 %v1308_v39, %v520_v40  ;;  %v1284_v39 = vld [vmem:[%s1430_s23 + $0x8] sm:$0xff] }
 0x20d   : > { %v597_v43 = vsel %vm596_vm3, %v521_v42, -inf }
 0x20e   : > { %598 = vmax.xlane.f32.xlu2 %v597_v43 }
 0x212   : > { %v522_v44 = vpop.f32.mrf.mxu1 }
 0x218   : > { %v568_v46 = vpop.f32.mrf.mxu3 }
 0x219   : > { %v569_v47 = vadd.f32 %v1309_v45, %v568_v46 }
 0x21b   : > { %v603_v48 = vsel %vm596_vm3, %v569_v47, -inf }
 0x21c   : > { %604 = vmax.xlane.f32.xlu0 %v603_v48 }
 0x220   : > { %v544_v50 = vpop.f32.mrf.mxu2  ;;  %v570_v51 = vpop.f32.mrf.mxu3 }
 0x221   : > { %v545_v52 = vadd.f32 %v1310_v49, %v544_v50 }
 0x223   : > { %v600_v53 = vsel %vm596_vm3, %v545_v52, -inf }
 0x224   : > { %601 = vmax.xlane.f32.xlu1 %v600_v53 }
 0x228   : > { %v546_v54 = vpop.f32.mrf.mxu2 }
 0x230   : > { %688 = vrot.lane.b32.xlu0 %v550_v17, %s1355_s18 }
 0x279   : > { %v608_v55 = vpop.xlane.xlu2 %607 }
 0x27a   : > { %v612_v56 = vsub.f32 %v593_v37, %v608_v55 }
 0x27c   : > { %v619_v57 = vmul.f32 1.442695, %v612_v56 }
 0x27e   : > { %1311 = vpow2.f32 %v619_v57 }
 0x281   : > { %v599_v58 = vpop.xlane.xlu2 %598 }
 0x282   : > { %v609_v59 = vsub.f32 %v521_v42, %v599_v58 }
 0x284   : > { %v1312_v60 = vpop.eup %1311  ;;  %v613_v61 = vmul.f32 1.442695, %v609_v59 }
 0x285   : > { %v630_v62 = vsel %vm596_vm3, %v1312_v60, 0.0 }
 0x286   : > { %1313 = vpow2.f32 %v613_v61  ;;  %631 = vadd.xlane.f32.xlu2 %v630_v62 }
 0x28c   : > { %v1314_v63 = vpop.eup %1313 }
 0x28d   : > { %v621_v0 = vsel %vm596_vm3, %v1314_v63, 0.0 }
 0x28e   : > { %622 = vadd.xlane.f32.xlu1 %v621_v0 }
 0x28f   : > { %v605_v1 = vpop.xlane.xlu0 %604 }
 0x290   : > { %v611_v2 = vsub.f32 %v569_v47, %v605_v1 }
 0x292   : > { %v617_v3 = vmul.f32 1.442695, %v611_v2 }
 0x294   : > { %1315 = vpow2.f32 %v617_v3 }
 0x297   : > { %v602_v6 = vpop.xlane.xlu1 %601 }
 0x298   : > { %v610_v8 = vsub.f32 %v545_v52, %v602_v6 }
 0x29a   : > { %v1316_v9 = vpop.eup %1315  ;;  %v615_v10 = vmul.f32 1.442695, %v610_v8 }
 0x29b   : > { %v627_v11 = vsel %vm596_vm3, %v1316_v9, 0.0 }
 0x29c   : > { %1317 = vpow2.f32 %v615_v10  ;;  %628 = vadd.xlane.f32.xlu0 %v627_v11 }
 0x29e   : > { %667 = vrot.lane.b32.xlu2 %v1462_v23, %s1355_s18 }
 0x2a2   : > { %v1318_v12 = vpop.eup %1317  ;;  %v689_v13 = vpop.permute.xlu0 %688 }
 0x2a3   : > { %v694_v14 = vsel %vm650_vm4, %v689_v13, 0  ;;  %v624_v15 = vsel %vm596_vm3, %v1318_v12, 0.0 }
 0x2a4   : > { %703 = vmatpush.bf16.msrb.mxu3 %v694_v14  ;;  %625 = vadd.xlane.f32.xlu1 %v624_v15 }
 0x2b0   : > { %645 = vrot.lane.b32.xlu0 %v1468_v26, %s1355_s18 }
 0x2bd   : > { %709 = vrot.lane.b32.xlu1 %v1464_v24, %s1355_s18 }
 0x2f9   : > { %v632_v16 = vpop.xlane.xlu2 %631 }
 0x301   : > { %v668_v17 = vpop.permute.xlu2 %667  ;;  %v623_v19 = vpop.xlane.xlu1 %622 }
 0x302   : > { %v673_v18 = vsel %vm650_vm4, %v668_v17, 0  ;;  %v1356_v17 = vmov 32.0  }
 0x303   : > { %682 = vmatpush.bf16.msrb.mxu2 %v673_v18 }
 0x307   : > { %787 = vmatpush.bf16.msra.mxu2 %v1284_v39 }
 0x30f   : > { %v629_v20 = vpop.xlane.xlu0 %628 }
 0x310   : > { %1319 = vrcp.f32 %v629_v20 }
 0x311   : > { %1321 = vrcp.f32 %v623_v19 }
 0x316   : > { %v1320_v21 = vpop.eup %1319 }
 0x317   : > { %v639_v22 = vmul.f32 %v1320_v21, %v1316_v9  ;;  %v626_v23 = vpop.xlane.xlu1 %625  ;;  %v1322_v26 = vpop.eup %1321 }
 0x318   : > { %1323 = vrcp.f32 %v626_v23  ;;  %v637_v24 = vmul.f32 %v1322_v26, %v1314_v63 }
 0x319   : > { %v643_v25 = vpack.c.bf16 %v639_v22, %v639_v22  ;;  %1325 = vrcp.f32 %v632_v16 }
 0x31a   : > { %v641_v32 = vpack.c.bf16 %v637_v24, %v637_v24  ;;  %1327 = vrcp.f32 %v1356_v17 }
 0x31b   : > { %1218 = vmatmul.msk.bf16.vlgmr.msrb.gmra.mxu3 %vm596_vm3, %v643_v25 }
 0x31e   : > { %v1324_v27 = vpop.eup %1323 }
 0x31f   : > { %v638_v28 = vmul.f32 %v1324_v27, %v1318_v12  ;;  %v1326_v33 = vpop.eup %1325  ;;  %v1286_v27 = vld [vmem:[%s1435_s26 + $0x8] sm:$0xff] }
 0x320   : > { %v640_v34 = vmul.f32 %v1326_v33, %v1312_v60  ;;  %v800_v60 = vperm.slane %v1459_v7, 1  ;;  %v1328_v18 = vpop.eup %1327  ;;  %893 = vmatpush.bf16.msra.mxu3 %v1286_v27 }
 0x321   : > { %v642_v29 = vpack.c.bf16 %v638_v28, %v638_v28  ;;  %v812_v19 = vmul.f32 32.0, %v1328_v18  ;;  %vm816_vm5 = vweird.f32 %v1328_v18 }
 0x322   : > { %v646_v30 = vpop.permute.xlu0 %645  ;;  %v644_v37 = vpack.c.bf16 %v640_v34, %v640_v34 }
 0x323   : > { %1217 = vmatmul.msk.bf16.vlgmr.msrb.gmra.mxu2 %vm596_vm3, %v642_v29  ;;  %v652_v31 = vsel %vm650_vm4, %v646_v30, 0  ;;  %v813_v20 = vsub.f32 1.0, %v812_v19  ;;  %v1285_v30 = vld [vmem:[%s1435_s26] sm:$0xff] }
 0x324   : > { %661 = vmatpush.bf16.msrb.mxu1 %v652_v31  ;;  %894 = vmatpush.bf16.msra.mxu3 %v1285_v30  ;;  %v928_v30 = vperm.slane %v1459_v7, 5 }
 0x325   : > { %v814_v21 = vmul.f32 %v1328_v18, %v813_v20 }
 0x327   : > { %1216 = vmatmul.msk.bf16.vlgmr.msrb.gmra.mxu1 %vm596_vm3, %v641_v32  ;;  %v815_v22 = vadd.f32 %v1328_v18, %v814_v21 }
 0x328   : > { %759 = vmatpush.bf16.msra.mxu1 %v1283_v38 }
 0x329   : > { %v1534_v23 = vsel %vm816_vm5, %v1328_v18, %v815_v22 }
 0x32f   : > { %v710_v35 = vpop.permute.xlu1 %709 }
 0x330   : > { %v715_v36 = vsel %vm650_vm4, %v710_v35, 0 }
 0x331   : > { %724 = vmatpush.bf16.msra.mxu0 %v715_v36 }
 0x334   : > { %1219 = vmatmul.msk.bf16.vlgmr.msra.gmra.mxu0 %vm596_vm3, %v644_v37 }
 0x39e   : > { %v705_v40 = vpop.f32.mrf.mxu3 }
 0x39f   : > { %v732_v51 = vpack.c.bf16 %v705_v40, %v705_v40 }
 0x3a1   : > { %v768_v54 = vunpack.c.l.b16 %v732_v51 }
 0x3a4   : > { %v663_v41 = vpop.f32.mrf.mxu1 }
 0x3a5   : > { %v730_v42 = vpack.c.bf16 %v663_v41, %v663_v41 }
 0x3a6   : > { %v684_v43 = vpop.f32.mrf.mxu2  ;;  %v707_v44 = vpop.f32.mrf.mxu3 }
 0x3a7   : > { %v731_v45 = vpack.c.bf16 %v684_v43, %v684_v43  ;;  %v740_v46 = vunpack.c.l.b16 %v730_v42 }
 0x3a9   : > { %v741_v47 = vunpack.c.l.b16 %v731_v45 }
 0x3ab   : > { %v742_v48 = vpack.c.b16 %v741_v47, %v740_v46 }
 0x3ac   : > { %v665_v49 = vpop.f32.mrf.mxu1 }
 0x3ad   : > { %1224 = vmatmul.msk.bf16.vlgmr.msra.gmra.mxu1 %vm504_vm2, %v742_v48 }
 0x3ae   : > { %v686_v50 = vpop.f32.mrf.mxu2 }
 0x3b1   : > { %v726_v52 = vpop.f32.mrf.mxu0 }
 0x3b2   : > { %v733_v53 = vpack.c.bf16 %v726_v52, %v726_v52  ;;  %v860_v52 = vperm.slane %v1459_v7, 2 }
 0x3b4   : > { %v769_v55 = vunpack.c.l.b16 %v733_v53 }
 0x3b6   : > { %v770_v56 = vpack.c.b16 %v769_v55, %v768_v54 }
 0x3b8   : > { %1229 = vmatmul.msk.bf16.vlgmr.msra.gmra.mxu2 %vm504_vm2, %v770_v56 }
 0x3b9   : > { %v728_v57 = vpop.f32.mrf.mxu0 }
 0x42a   : > { %v761_v58 = vpop.f32.mrf.mxu1 }
 0x42b   : > { %v794_v61 = vsel %vm453_vm1, %v761_v58, 0.0 }
 0x432   : > { %v763_v1 = vpop.f32.mrf.mxu1 }
 0x433   : > { %v797_v9 = vsel %vm453_vm1, %v763_v1, 0.0  ;;  %v1289_v1 = vld [vmem:[%s1440_s29 + $0x10] sm:$0xff] }
 0x43b   : > { %v789_v59 = vpop.f32.mrf.mxu2 }
 0x43c   : > { %v795_v62 = vsel %vm453_vm1, %v789_v59, 0.0  ;;  %v863_v59 = vperm.slane %v1459_v7, 3 }
 0x43d   : > { %v796_v63 = vadd.f32 %v795_v62, %v794_v61 }
 0x43f   : > { %v801_v0 = vadd.f32 %v800_v60, %v796_v63 }
 0x441   : > { %v1522_v2 = vadd.f32 %v801_v0, %v1452_v4  ;;  %v1290_v0 = vld [vmem:[%s1440_s29 + $0x18] sm:$0xff] }
 0x442   : > { %961 = vmatpush.bf16.msrb.mxu0 %v1290_v0 }
 0x443   : > { %v791_v3 = vpop.f32.mrf.mxu2  ;;  %v805_v6 = vsel %vm453_vm1, %v1522_v2, 0.0  ;;  %v820_v8 = vmul.f32 %v1522_v2, %v1522_v2 }
 0x444   : > { %v798_v10 = vsel %vm453_vm1, %v791_v3, 0.0  ;;  %806 = vadd.xlane.f32.xlu0 %v805_v6  ;;  %v1287_v3 = vld [vmem:[%s1440_s29] sm:$0xff]  ;;  %v871_v6 = vperm.slane %v1459_v7, 4 }
 0x445   : > { %v799_v11 = vadd.f32 %v798_v10, %v797_v9  ;;  %v822_v12 = vsel %vm453_vm1, %v820_v8, 0.0 }
 0x446   : > { %823 = vadd.xlane.f32.xlu1 %v822_v12  ;;  %962 = vmatpush.bf16.msrb.mxu0 %v1289_v1 }
 0x447   : > { %v802_v13 = vadd.f32 %v800_v60, %v799_v11 }
 0x449   : > { %v804_v4 = vadd.f32 %v802_v13, %v1454_v5 }
 0x44b   : > { %v808_v14 = vsel %vm453_vm1, %v804_v4, 0.0  ;;  %v821_v15 = vmul.f32 %v804_v4, %v804_v4 }
 0x44c   : > { %809 = vadd.xlane.f32.xlu2 %v808_v14 }
 0x44d   : > { %v825_v16 = vsel %vm453_vm1, %v821_v15, 0.0 }
 0x44e   : > { %826 = vadd.xlane.f32.xlu0 %v825_v16 }
 0x4b7   : > { %v807_v5 = vpop.xlane.xlu0 %806 }
 0x4b8   : > { %v818_v25 = vmul.f32 %v1534_v23, %v807_v5 }
 0x4b9   : > { %v824_v26 = vpop.xlane.xlu1 %823 }
 0x4ba   : > { %v830_v28 = vmul.f32 %v818_v25, %v818_v25  ;;  %v828_v24 = vmul.f32 %v824_v26, %v1534_v23  ;;  %v834_v50 = vsub.f32 %v1522_v2, %v818_v25  ;;  %v1288_v2 = vld [vmem:[%s1440_s29 + $0x8] sm:$0xff] }
 0x4bb   : > { %963 = vmatpush.bf16.msrb.mxu0 %v1288_v2  ;;  %v1021_v2 = vperm.slane %v1459_v7, 6 }
 0x4bc   : > { %v832_v29 = vsub.f32 %v828_v24, %v830_v28 }
 0x4be   : > { %v836_v31 = vadd.f32 1e-12, %v832_v29 }
 0x4bf   : > { %v810_v32 = vpop.xlane.xlu2 %809  ;;  %964 = vmatpush.bf16.msrb.mxu0 %v1287_v3 }
 0x4c0   : > { %1329 = vrsqrt.f32 %v836_v31  ;;  %v819_v33 = vmul.f32 %v1534_v23, %v810_v32  ;;  %vm844_vm7 = vweird.f32 %v836_v31 }
 0x4c1   : > { %v827_v34 = vpop.xlane.xlu0 %826 }
 0x4c2   : > { %v831_v35 = vmul.f32 %v819_v33, %v819_v33  ;;  %v829_v36 = vmul.f32 %v827_v34, %v1534_v23  ;;  %v835_v55 = vsub.f32 %v804_v4, %v819_v33 }
 0x4c4   : > { %v833_v37 = vsub.f32 %v829_v36, %v831_v35 }
 0x4c6   : > { %v1330_v38 = vpop.eup %1329  ;;  %v837_v39 = vadd.f32 1e-12, %v833_v37 }
 0x4c7   : > { %v839_v40 = vmul.f32 %v1330_v38, %v836_v31  ;;  %vm845_vm6 = vweird.f32 %v1330_v38 }
 0x4c8   : > { %1331 = vrsqrt.f32 %v837_v39  ;;  %vm846_vm8 = vmor %vm844_vm7, %vm845_vm6  ;;  %vm854_vm10 = vweird.f32 %v837_v39 }
 0x4c9   : > { %v840_v41 = vmul.f32 %v1330_v38, %v839_v40 }
 0x4cb   : > { %v841_v42 = vmul.f32 0.5, %v840_v41 }
 0x4cd   : > { %v842_v43 = vsub.f32 1.5, %v841_v42 }
 0x4ce   : > { %v1332_v44 = vpop.eup %1331 }
 0x4cf   : > { %v843_v45 = vmul.f32 %v1330_v38, %v842_v43  ;;  %v849_v46 = vmul.f32 %v1332_v44, %v837_v39  ;;  %vm855_vm9 = vweird.f32 %v1332_v44 }
 0x4d0   : > { %vm856_vm11 = vmor %vm854_vm10, %vm855_vm9 }
 0x4d1   : > { %v850_v47 = vmul.f32 %v1332_v44, %v849_v46  ;;  %v847_v48 = vsel %vm846_vm8, %v1330_v38, %v843_v45 }
 0x4d2   : > { %v858_v53 = vmul.f32 %v847_v48, %v834_v50 }
 0x4d3   : > { %v851_v49 = vmul.f32 0.5, %v850_v47 }
 0x4d4   : > { %v861_v57 = vmul.f32 %v860_v52, %v858_v53 }
 0x4d5   : > { %v852_v51 = vsub.f32 1.5, %v851_v49 }
 0x4d6   : > { %v864_v61 = vadd.f32 %v863_v59, %v861_v57 }
 0x4d7   : > { %v853_v54 = vmul.f32 %v1332_v44, %v852_v51 }
 0x4d9   : > { %v857_v56 = vsel %vm856_vm11, %v1332_v44, %v853_v54 }
 0x4da   : > { %v859_v58 = vmul.f32 %v857_v56, %v835_v55 }
 0x4dc   : > { %v862_v60 = vmul.f32 %v860_v52, %v859_v58 }
 0x4de   : > { %v865_v62 = vadd.f32 %v863_v59, %v862_v60 }
 0x4e0   : > { %v870_v63 = vpack.c.bf16 %v865_v62, %v864_v61 }
 0x4e2   : > { %1238 = vmatmul.msk.bf16.vlgmr.msra.gmra.mxu3 %vm453_vm1, %v870_v63 }
 0x565   : > { %v896_v8 = vpop.f32.mrf.mxu3 }
 0x566   : > { %v897_v9 = vadd.f32 %v896_v8, %v871_v6 }
 0x568   : > { %v903_v10 = vmul.f32 0.044715, %v897_v9  ;;  %v901_v25 = vmul.f32 0.5, %v897_v9 }
 0x56a   : > { %v905_v11 = vmul.f32 %v903_v10, %v897_v9 }
 0x56c   : > { %v907_v12 = vmul.f32 %v905_v11, %v897_v9 }
 0x56d   : > { %v898_v13 = vpop.f32.mrf.mxu3 }
 0x56e   : > { %v909_v4 = vadd.f32 %v907_v12, %v897_v9  ;;  %v899_v14 = vadd.f32 %v898_v13, %v871_v6 }
 0x570   : > { %v904_v15 = vmul.f32 0.044715, %v899_v14  ;;  %v911_v16 = vmul.f32 0.7978846, %v909_v4  ;;  %v902_v26 = vmul.f32 0.5, %v899_v14 }
 0x572   : > { %v906_v17 = vmul.f32 %v904_v15, %v899_v14  ;;  %1333 = vtanh.f32 %v911_v16 }
 0x574   : > { %v908_v18 = vmul.f32 %v906_v17, %v899_v14 }
 0x576   : > { %v910_v19 = vadd.f32 %v908_v18, %v899_v14 }
 0x578   : > { %v912_v20 = vmul.f32 0.7978846, %v910_v19  ;;  %v1334_v21 = vpop.eup %1333 }
 0x579   : > { %v915_v22 = vadd.f32 1.0, %v1334_v21 }
 0x57a   : > { %1335 = vtanh.f32 %v912_v20 }
 0x57b   : > { %v917_v28 = vmul.f32 %v915_v22, %v901_v25 }
 0x580   : > { %v1336_v5 = vpop.eup %1335 }
 0x581   : > { %v916_v27 = vadd.f32 1.0, %v1336_v5 }
 0x583   : > { %v918_v24 = vmul.f32 %v916_v27, %v902_v26 }
 0x585   : > { %v927_v29 = vpack.c.bf16 %v918_v24, %v917_v28 }
 0x587   : > { %1255 = vmatmul.msk.bf16.vlgmr.msrb.gmra.mxu0 %vm953_vm12, %v927_v29 }
 0x604   : > { %v966_v31 = vpop.f32.mrf.mxu0 }
 0x605   : > { %v967_v32 = vadd.f32 %v966_v31, %v928_v30 }
 0x607   : > { %v971_v33 = vadd.f32 %v967_v32, %v864_v61 }
 0x609   : > { %v973_v34 = vsel %vm453_vm1, %v971_v33, 0.0  ;;  %v981_v35 = vmul.f32 %v971_v33, %v971_v33 }
 0x60a   : > { %974 = vadd.xlane.f32.xlu2 %v973_v34 }
 0x60b   : > { %v983_v36 = vsel %vm453_vm1, %v981_v35, 0.0 }
 0x60c   : > { %v968_v37 = vpop.f32.mrf.mxu0  ;;  %984 = vadd.xlane.f32.xlu0 %v983_v36 }
 0x60d   : > { %v969_v38 = vadd.f32 %v968_v37, %v928_v30 }
 0x60f   : > { %v972_v39 = vadd.f32 %v969_v38, %v865_v62 }
 0x611   : > { %v976_v40 = vsel %vm453_vm1, %v972_v39, 0.0  ;;  %v982_v41 = vmul.f32 %v972_v39, %v972_v39 }
 0x612   : > { %977 = vadd.xlane.f32.xlu1 %v976_v40 }
 0x613   : > { %v986_v42 = vsel %vm453_vm1, %v982_v41, 0.0 }
 0x614   : > { %987 = vadd.xlane.f32.xlu2 %v986_v42 }
 0x67d   : > { %v975_v43 = vpop.xlane.xlu2 %974 }
 0x67e   : > { %v979_v44 = vmul.f32 %v975_v43, %v1534_v23 }
 0x67f   : > { %v985_v45 = vpop.xlane.xlu0 %984 }
 0x680   : > { %v991_v46 = vmul.f32 %v979_v44, %v979_v44  ;;  %v989_v47 = vmul.f32 %v985_v45, %v1534_v23  ;;  %v995_v1 = vsub.f32 %v971_v33, %v979_v44 }
 0x682   : > { %v993_v48 = vsub.f32 %v989_v47, %v991_v46 }
 0x684   : > { %v997_v49 = vadd.f32 1e-12, %v993_v48 }
 0x685   : > { %v978_v50 = vpop.xlane.xlu1 %977 }
 0x686   : > { %1337 = vrsqrt.f32 %v997_v49  ;;  %v980_v51 = vmul.f32 %v978_v50, %v1534_v23  ;;  %vm1005_vm14 = vweird.f32 %v997_v49 }
 0x687   : > { %v988_v52 = vpop.xlane.xlu2 %987 }
 0x688   : > { %v992_v53 = vmul.f32 %v980_v51, %v980_v51  ;;  %v990_v54 = vmul.f32 %v988_v52, %v1534_v23  ;;  %v1024_v23 = vperm.slane %v1459_v7, 7  ;;  %v996_v4 = vsub.f32 %v972_v39, %v980_v51 }
 0x68a   : > { %v994_v55 = vsub.f32 %v990_v54, %v992_v53 }
 0x68c   : > { %v1338_v56 = vpop.eup %1337  ;;  %v998_v57 = vadd.f32 1e-12, %v994_v55 }
 0x68d   : > { %v1000_v58 = vmul.f32 %v1338_v56, %v997_v49  ;;  %vm1006_vm13 = vweird.f32 %v1338_v56 }
 0x68e   : > { %1339 = vrsqrt.f32 %v998_v57  ;;  %vm1007_vm15 = vmor %vm1005_vm14, %vm1006_vm13  ;;  %vm1015_vm2 = vweird.f32 %v998_v57 }
 0x68f   : > { %v1001_v59 = vmul.f32 %v1338_v56, %v1000_v58 }
 0x691   : > { %v1002_v60 = vmul.f32 0.5, %v1001_v59 }
 0x693   : > { %v1003_v61 = vsub.f32 1.5, %v1002_v60 }
 0x694   : > { %v1340_v62 = vpop.eup %1339 }
 0x695   : > { %v1004_v63 = vmul.f32 %v1338_v56, %v1003_v61  ;;  %v1010_v0 = vmul.f32 %v1340_v62, %v998_v57  ;;  %vm1016_vm0 = vweird.f32 %v1340_v62 }
 0x696   : > { %vm1017_vm3 = vmor %vm1015_vm2, %vm1016_vm0 }
 0x697   : > { %v1008_v3 = vsel %vm1007_vm15, %v1338_v56, %v1004_v63  ;;  %v1011_v6 = vmul.f32 %v1340_v62, %v1010_v0 }
 0x698   : > { %v1019_v8 = vmul.f32 %v1008_v3, %v995_v1 }
 0x699   : > { %v1012_v9 = vmul.f32 0.5, %v1011_v6 }
 0x69a   : > { %v1022_v10 = vmul.f32 %v1021_v2, %v1019_v8 }
 0x69b   : > { %v1013_v11 = vsub.f32 1.5, %v1012_v9 }
 0x69c   : > { %v1025_v12 = vadd.f32 %v1024_v23, %v1022_v10 }
 0x69d   : > { %v1014_v13 = vmul.f32 %v1340_v62, %v1013_v11 }
 0x69e   : > { %1027 = vst.msk [vmem:[#allocation2] sm:$0xff] %vm453_vm1, %v1025_v12 }
 0x69f   : > { %v1018_v14 = vsel %vm1017_vm3, %v1340_v62, %v1014_v13 }
 0x6a0   : > { %v1020_v15 = vmul.f32 %v1018_v14, %v996_v4 }
 0x6a2   : > { %v1023_v16 = vmul.f32 %v1021_v2, %v1020_v15  ;;  %1032 = sbr.rel (%p1256_p5) target bundleno = 1982 (0x7be), region = 68 }
 0x6a4   : > { %v1026_v17 = vadd.f32 %v1024_v23, %v1023_v16 }
 0x6a6   : > { %1028 = vst.msk [vmem:[#allocation2 + $0x8] sm:$0xff] %vm453_vm1, %v1026_v17 }
 0x6a7   : > { %v1292_v7 = vld [vmem:[%s1598_s7 + $0x8] sm:$0xff]  ;;  %v1035_v18 = vrot.slane %v1026_v17, 7  ;;  %vm1036_vm4 = vcmask 1041409   ;;  %vm1039_vm5 = vcmask 1041408   ;;  %v1291_v19 = vld [vmem:[%s1598_s7] sm:$0xff] }
 0x6a8   : > { %1069 = vmatpush.bf16.msra.mxu0 %v1292_v7  ;;  %v1294_v5 = vld [vmem:[%s1599_s8 + $0x8] sm:$0xff]  ;;  %v1293_v25 = vld [vmem:[%s1599_s8] sm:$0xff] }
 0x6a9   : > { %v1037_v20 = vsel %vm1036_vm4, %v1035_v18, %v1025_v12  ;;  %1105 = vmatpush.bf16.msra.mxu1 %v1294_v5  ;;  %v1341_v26 = vld [vmem:[%s1600_s9] ss:$0 sm:$0xff]  ;;  %v1342_v31 = vld [vmem:[%s1600_s9 + $0x1] ss:$0 sm:$0xff] }
 0x6aa   : > { %v1040_v21 = vsel %vm1039_vm5, %v1037_v20, 0.0 }
 0x6ab   : > { %v1046_v22 = vpack.c.bf16 %v1040_v21, %v1040_v21 }
 0x6ac   : > { %1070 = vmatpush.bf16.msra.mxu0 %v1291_v19 }
 0x6ad   : > { %1106 = vmatpush.bf16.msra.mxu1 %v1293_v25 }
 0x6af   : > { %1265 = vmatmul.msk.bf16.vlgmr.msra.gmra.mxu0 %vm453_vm1, %v1046_v22 }
 0x72c   : > { %v1072_v27 = vpop.f32.mrf.mxu0 }
 0x72d   : > { %v1073_v28 = vadd.f32 %v1341_v26, %v1072_v27 }
 0x72f   : > { %1343 = vtanh.f32 %v1073_v28 }
 0x734   : > { %v1074_v24 = vpop.f32.mrf.mxu0 }
 0x735   : > { %v1344_v29 = vpop.eup %1343 }
 0x736   : > { %v1082_v30 = vpack.c.bf16 %v1344_v29, %v1344_v29 }
 0x738   : > { %1274 = vmatmul.msk.bf16.vlgmr.msra.gmra.mxu1 %vm453_vm1, %v1082_v30 }
 0x7b5   : > { %v1108_v32 = vpop.f32.mrf.mxu1 }
 0x7b6   : > { %v1109_v33 = vadd.f32 %v1342_v31, %v1108_v32 }
 0x7b8   : > { %1112 = vst [vmem:[%s1601_s10] sm:$0xff] %v1109_v33 }
 0x7bd   : > { %v1110_v34 = vpop.f32.mrf.mxu1 }
 0x7be PF: > { %s20_s13 = sadd.s32 1, %s1351_s13  }
 0x7bf   : > { %p17_p6 = scmp.ge.s32.totalorder %s20_s13, 4  }
 0x7c1   :  { %19 = sbr.rel (!%p17_p6) target bundleno = 1 (0x1), region = 106 }

</bundles_post_ra>
